<compile_context>
chip_gen: v5e
topology: v5e:2x2
jax: 0.10.0
libtpu: 0.0.40
codegen_flags: <defaults>
</compile_context>

<pallas_src>
import jax
import jax.numpy as jnp
from jax.experimental import pallas as pl
from jax.experimental.pallas import tpu as pltpu


def channel_attention_kernel(x_ref, w1t_ref, w2t_ref, o_ref, *, inv_hw):
    # x_ref: (B_TILE, C, HW) block (full C and HW, tiled over batch)
    xb = x_ref[...]                                           # (Bt, C, HW)

    # Global average pool over spatial: sum * (1/HW)  -> (Bt, C)
    pooled = jnp.sum(xb, axis=2) * inv_hw                     # (Bt, C)

    # fc1 (batched over the tile): (Bt, C) @ (C, hidden) -> (Bt, hidden), ReLU
    h = jnp.dot(pooled, w1t_ref[...], preferred_element_type=jnp.float32)
    h = jnp.maximum(h, 0.0)                                   # (Bt, hidden)

    # fc2: (Bt, hidden) @ (hidden, C) -> (Bt, C), sigmoid
    y = jnp.dot(h, w2t_ref[...], preferred_element_type=jnp.float32)
    s = jax.nn.sigmoid(y)                                     # (Bt, C)

    # out = x * (1 + s), broadcast (Bt, C, 1) over (Bt, C, HW); write directly.
    o_ref[...] = xb * (1.0 + s[:, :, None])


def _pick_b_tile(B, C, HW, vmem_budget_bytes=8 * 1024 * 1024):
    """Largest divisor of B whose (in+out, double-buffered) blocks fit the
    budget, while keeping >= 2 grid steps when B >= 2 (v7x dual TC)."""
    per_sample = C * HW * 4                       # f32 bytes per sample
    # 2 buffers for input + 2 for output per block in the pipeline.
    max_tile = max(1, vmem_budget_bytes // (4 * per_sample))
    divisors = [d for d in range(1, B + 1) if B % d == 0 and d <= max_tile]
    b_tile = max(divisors) if divisors else 1
    if B >= 2 and b_tile == B:
        halves = [d for d in divisors if d <= B // 2]
        if halves:
            b_tile = max(halves)                  # keep >= 2 parallel steps
    return b_tile


def channel_attention(x, w1, w2):
    """x: (B, C, H, W) f32; w1: (C//16, C); w2: (C, C//16). Returns (B, C, H, W)."""
    B, C, H, W = x.shape
    HW = H * W
    hidden = w1.shape[0]

    x_flat = x.reshape(B, C, HW)
    # Pre-transpose weights on the host so in-kernel matmuls are plain
    # row-major (Bt,C)@(C,hidden) and (Bt,hidden)@(hidden,C).
    w1_t = w1.T                                   # (C, hidden)
    w2_t = w2.T                                   # (hidden, C)

    b_tile = _pick_b_tile(B, C, HW)
    grid = (pl.cdiv(B, b_tile),)

    inv_hw = 1.0 / float(HW)

    import functools
    kernel = functools.partial(channel_attention_kernel, inv_hw=inv_hw)

    # Memory-bound: stream x in and out once; weights are negligible.
    bytes_accessed = 2 * B * C * HW * 4 + (w1.size + w2.size) * 4
    cost = pl.CostEstimate(
        flops=3 * B * C * HW + 4 * B * C * hidden,
        transcendentals=B * C,
        bytes_accessed=bytes_accessed,
    )

    out_flat = pl.pallas_call(
        kernel,
        out_shape=jax.ShapeDtypeStruct((B, C, HW), jnp.float32),
        grid_spec=pltpu.PrefetchScalarGridSpec(
            num_scalar_prefetch=0,
            grid=grid,
            in_specs=[
                pl.BlockSpec((b_tile, C, HW), lambda b: (b, 0, 0)),
                pl.BlockSpec((C, hidden), lambda b: (0, 0)),
                pl.BlockSpec((hidden, C), lambda b: (0, 0)),
            ],
            out_specs=pl.BlockSpec((b_tile, C, HW), lambda b: (b, 0, 0)),
        ),
        compiler_params=pltpu.CompilerParams(
            dimension_semantics=("parallel",),
        ),
        cost_estimate=cost,
    )(x_flat, w1_t, w2_t)

    return out_flat.reshape(B, C, H, W)


def channel_attention_ref(x, w1, w2):
    """Pure-JAX reference matching the PyTorch module."""
    y = jnp.mean(x, axis=(2, 3))                 # (B, C)
    y = jnp.maximum(y @ w1.T, 0.0)               # (B, hidden)
    y = jax.nn.sigmoid(y @ w2.T)                 # (B, C)
    return x * (1.0 + y[:, :, None, None])


if __name__ == "__main__":
    # in_channels must be >= 16 so hidden = C // 16 >= 1 (matches PyTorch spec).
    # HW = 16*16 = 256 keeps the lane axis a dense multiple of 128.
    B, C, H, W = 4, 32, 16, 16
    hidden = C // 16

    key = jax.random.PRNGKey(0)
    kx, k1, k2 = jax.random.split(key, 3)
    x = jax.random.normal(kx, (B, C, H, W), dtype=jnp.float32)
    # PyTorch Linear convention: (out_features, in_features), bias-free.
    w1 = 0.1 * jax.random.normal(k1, (hidden, C), dtype=jnp.float32)
    w2 = 0.1 * jax.random.normal(k2, (C, hidden), dtype=jnp.float32)

    out = channel_attention(x, w1, w2)
    out = jax.block_until_ready(out)

    ref = channel_attention_ref(x, w1, w2)
    assert out.shape == (B, C, H, W)
    assert jnp.allclose(out, ref, atol=1e-5, rtol=1e-5), "mismatch vs reference"

    print("KERNEL_OK")
</pallas_src>

<mosaic_0001>
module attributes {stable_mosaic.version = 11 : i64} {
  func.func @channel_attention_kernel(%arg0: i32, %arg1: memref<2x32x256xf32, #tpu.memory_space<vmem>>, %arg2: memref<32x2xf32, #tpu.memory_space<vmem>>, %arg3: memref<2x32xf32, #tpu.memory_space<vmem>>, %arg4: memref<2x32x256xf32, #tpu.memory_space<vmem>>) attributes {dimension_semantics = [#tpu.dimension_semantics<parallel>], iteration_bounds = array<i64: 2>, scalar_prefetch = 0 : i64, scratch_operands = 0 : i64, tpu.core_type = #tpu.core_type<tc>, window_params = [{transform_indices = @transform_0, window_bounds = array<i64: 2, 32, 256>}, {pipeline_mode = #tpu.pipeline_mode<synchronous>, transform_indices = @transform_1, window_bounds = array<i64: 32, 2>}, {pipeline_mode = #tpu.pipeline_mode<synchronous>, transform_indices = @transform_2, window_bounds = array<i64: 2, 32>}, {transform_indices = @transform_3, window_bounds = array<i64: 2, 32, 256>}]} {
    %c0 = arith.constant 0 : index
    %c0_0 = arith.constant 0 : index
    %c0_1 = arith.constant 0 : index
    %0 = vector.load %arg1[%c0, %c0_0, %c0_1] : memref<2x32x256xf32, #tpu.memory_space<vmem>>, vector<2x32x256xf32>
    %cst = arith.constant dense<0.000000e+00> : vector<2x32xf32>
    %1 = vector.multi_reduction <add>, %0, %cst [2] : vector<2x32x256xf32> to vector<2x32xf32>
    %cst_2 = arith.constant 3.906250e-03 : f32
    %2 = vector.broadcast %cst_2 : f32 to vector<2x32xf32>
    %3 = arith.mulf %1, %2 : vector<2x32xf32>
    %c0_3 = arith.constant 0 : index
    %c0_4 = arith.constant 0 : index
    %4 = vector.load %arg2[%c0_3, %c0_4] : memref<32x2xf32, #tpu.memory_space<vmem>>, vector<32x2xf32>
    %cst_5 = arith.constant dense<0.000000e+00> : vector<2x2xf32>
    %5 = tpu.matmul %3, %4, %cst_5 {dimension_numbers = #tpu.dot_dimension_numbers<[1], [0], [0], [1], [0, 0, 1, 1], [], []>} : vector<2x32xf32>, vector<32x2xf32>, vector<2x2xf32> -> vector<2x2xf32>
    %cst_6 = arith.constant 0.000000e+00 : f32
    %6 = vector.broadcast %cst_6 : f32 to vector<2x2xf32>
    %7 = arith.maximumf %5, %6 : vector<2x2xf32>
    %c0_7 = arith.constant 0 : index
    %c0_8 = arith.constant 0 : index
    %8 = vector.load %arg3[%c0_7, %c0_8] : memref<2x32xf32, #tpu.memory_space<vmem>>, vector<2x32xf32>
    %cst_9 = arith.constant dense<0.000000e+00> : vector<2x32xf32>
    %9 = tpu.matmul %7, %8, %cst_9 {dimension_numbers = #tpu.dot_dimension_numbers<[1], [0], [0], [1], [0, 0, 1, 1], [], []>} : vector<2x2xf32>, vector<2x32xf32>, vector<2x32xf32> -> vector<2x32xf32>
    %10 = arith.negf %9 : vector<2x32xf32>
    %11 = math.exp %10 : vector<2x32xf32>
    %cst_10 = arith.constant 1.000000e+00 : f32
    %12 = vector.broadcast %cst_10 : f32 to vector<2x32xf32>
    %13 = arith.addf %12, %11 : vector<2x32xf32>
    %14 = arith.divf %12, %13 : vector<2x32xf32>
    %15 = vector.shape_cast %14 : vector<2x32xf32> to vector<2x32x1xf32>
    %cst_11 = arith.constant 1.000000e+00 : f32
    %16 = vector.broadcast %cst_11 : f32 to vector<2x32x1xf32>
    %17 = arith.addf %16, %15 : vector<2x32x1xf32>
    %18 = vector.broadcast %17 : vector<2x32x1xf32> to vector<2x32x256xf32>
    %19 = arith.mulf %0, %18 : vector<2x32x256xf32>
    %c0_12 = arith.constant 0 : index
    %c0_13 = arith.constant 0 : index
    %c0_14 = arith.constant 0 : index
    %20 = vector.load %arg4[%c0_12, %c0_13, %c0_14] : memref<2x32x256xf32, #tpu.memory_space<vmem>>, vector<2x32x256xf32>
    tpu.vector_store %arg4[%c0_12, %c0_13, %c0_14], %19 {strides = array<i32>} : memref<2x32x256xf32, #tpu.memory_space<vmem>>, vector<2x32x256xf32>,
    return
  }
  func.func @transform_0(%arg0: i32) -> (i32, i32, i32) {
    %c0_i32 = arith.constant 0 : i32
    %c0_i32_0 = arith.constant 0 : i32
    %c0_i32_1 = arith.constant 0 : i32
    return %arg0, %c0_i32, %c0_i32_0 : i32, i32, i32
  }
  func.func @transform_1(%arg0: i32) -> (i32, i32) {
    %c0_i32 = arith.constant 0 : i32
    %c0_i32_0 = arith.constant 0 : i32
    %c0_i32_1 = arith.constant 0 : i32
    return %c0_i32, %c0_i32_0 : i32, i32
  }
  func.func @transform_2(%arg0: i32) -> (i32, i32) {
    %c0_i32 = arith.constant 0 : i32
    %c0_i32_0 = arith.constant 0 : i32
    %c0_i32_1 = arith.constant 0 : i32
    return %c0_i32, %c0_i32_0 : i32, i32
  }
  func.func @transform_3(%arg0: i32) -> (i32, i32, i32) {
    %c0_i32 = arith.constant 0 : i32
    %c0_i32_0 = arith.constant 0 : i32
    %c0_i32_1 = arith.constant 0 : i32
    return %arg0, %c0_i32, %c0_i32_0 : i32, i32, i32
  }
}

</mosaic_0001>

<bundles_post_ra>
// kernel: tpu_custom_call.1
= control target key start
LH: loop header
LB: loop body
LE: loop exit
PB: predicated region body
PF: predicated region fallthrough
CT: control target
= control target key end

     0   :  { %8 = vsyncpa [#allocation3], 0  ;;  %s968_s0 = inlined_call_operand.hbm [shape: f32[4,32,256], index: 0, kind: input, shape index: {}]   ;;  %s969_s1 = inlined_call_operand.vmem [shape: f32[32,2], index: 1, kind: input, shape index: {}]   ;;  %s970_s2 = inlined_call_operand.vmem [shape: f32[2,32], index: 2, kind: input, shape index: {}]   ;;  %s971_s3 = inlined_call_operand.hbm [shape: f32[4,32,256], index: 3, kind: output, shape index: {}]  }
   0x1   :  { %10 = vsyncpa [#allocation3 + $0x1], 0 }
   0x2   :  { %11 = vsyncpa [#allocation4], 0 }
   0x3   :  { %13 = vsyncpa [#allocation4 + $0x1], 0  ;;  %s739_s12 = smov 0   ;;  %s741_s13 = smov 0  }
   0x4   :  { %s743_s14 = smov 0   ;;  %s745_s15 = smov 0  }
   0x5 LB: > { %s760_s16 = sadd.s32 4294967295, %s713_s15   ;;  %s530_s17 = sadd.s32 4294967294, %s713_s15   ;;  %s713_s15 = sphi %s745_s15, %s981_s15   ;;  %s709_s14 = sphi %s743_s14, %s980_s14   ;;  %s705_s13 = sphi %s741_s13, %s979_s13   ;;  %s701_s12 = sphi %s739_s12, %s978_s12  }
   0x6   : > { %s764_s18 = sadd.s32 1, %s713_s15   ;;  %s26_s19 = sadd.s32 1, %s709_s14 }
   0x7   : > { %s23_s20 = ssub.s32 %s713_s15, %s764_s18  ;;  %p33_p0 = scmp.ne.s32.totalorder %s709_s14, %s705_s13 }
   0x8   : > { %p24_p1 = scmp.eq.s32.totalorder %s23_s20, 0  ;;  %p34_p2 = scmp.eq.s32.totalorder %s713_s15, 0 }
   0x9   : > { %p39_p3 = scmp.ne.s32.totalorder %s705_s13, %s701_s12  ;;  %p40_p4 = scmp.eq.s32.totalorder %s760_s16, 0 }
   0xa   : > { %s776_s21 = scalar_select %p24_p1, %s709_s14, %s26_s19  }
   0xb   : > { %p778_p5 = por %p34_p2, %p33_p0  ;;  %p782_p6 = por %p40_p4, %p39_p3 }
   0xc   : > { %p105_p7 = scmp.eq.s32.totalorder %s760_s16, 1  ;;  %p111_p8 = scmp.eq.s32.totalorder %s530_s17, 1 }
   0xd   : > { %p566_p10 = scmp.lt.s32.totalorder %s713_s15, 2  ;;  %s137_s26 = sand.u32 1, %s709_s14  }
   0xe   : > { %p789_p11 = por %p105_p7, %p33_p0  ;;  %p793_p12 = por %p111_p8, %p39_p3 }
   0xf   : > { %s551_s27 = sshll.u32 %s713_s15, 7  ;;  %s533_s28 = sshll.u32 %s137_s26, 7 }
  0x10   : > { %s147_s4 = scalar_lea.hbm %s968_s0, %s551_s27  ;;  %s141_s6 = scalar_lea.vmem [#allocation2], %s533_s28 }
  0x11   : > { %s148_s5 = sshll.u32 %s147_s4, 4  ;;  %s150_s7 = sshll.u32 %s141_s6, 4  ;;  %s149_s5 = int_to_ptr.hbm [resolvable:$true] %s148_s5  ;;  %s151_s7 = int_to_ptr.vmem [resolvable:$true] %s150_s7 }
  0x12   : > { %p804_p13 = pnand %p566_p10, %p778_p5  ;;  %p537_p0 = scmp.ge.s32.totalorder %s713_s15, 1 }
  0x13   : > { %p158_p1 = scmp.lt.s32.totalorder %s713_s15, 3  ;;  %s138_s9 = scalar_lea.sflag [#allocation3], %s137_s26 }
  0x14   : > { %s617_s10 = sshra.s32 %s149_s5, 4  ;;  %p621_p3 = pneg %p804_p13  ;;  %s618_s10 = int_to_ptr.hbm [resolvable:$true] %s617_s10 }
  0x15   : > { %s619_s11 = scalar_lea.hbm %s618_s10, 128  ;;  %s624_s20 = scalar_lea.hbm %s968_s0, 256 }
  0x16   : > { %p620_p2 = scmp.ne.s32.totalorder %s618_s10, %s619_s11  ;;  %p625_p5 = scmp.lt.s32.totalorder %s618_s10, %s968_s0 }
  0x17   : > { %p626_p8 = scmp.lt.s32.totalorder %s624_s20, %s619_s11 }
  0x18   : > { %p622_p4 = pnand %p621_p3, %p620_p2 }
  0x19   : > { %p627_p10 = por %p626_p8, %p625_p5 }
  0x1a   : > { %p623_p7 = pneg %p622_p4 }
  0x1c   : > { %p628_p9 = pnand %p627_p10, %p623_p7 }
  0x1e   : > { %631 = shalt.err (!%p628_p9)
}
  0x1f   : > { %s715_s26 = smov 256   ;;  %s716_s28 = smov 16  }
  0x20   : > { %561 = dma.hbm_to_vmem [thread:$0]  (!%p804_p13), %s149_s5, 2048, %s151_s7, %s138_s9, %s715_s26, %s715_s26, %s716_s28  }
  0x21   : > { %p159_p2 = pnand %p537_p0, %p158_p1 }
  0x22   : > { %s825_s29 = sand.u32 (!%p159_p2), 1, %s705_s13  }
  0x23   : > { %162 = sbr.rel (%p159_p2) target bundleno = 623 (0x26f), region = 32  ;;  %s538_s30 = sshll.u32 (!%p159_p2), %s825_s29, 7 }
  0x24   : > { %s165_s4 = scalar_lea.sflag (!%p159_p2), [#allocation3], %s825_s29  ;;  %s168_s6 = scalar_lea.vmem (!%p159_p2), [#allocation2], %s538_s30 }
  0x28   : > { %692 = dma.done.wait (%p782_p6), %s165_s4, 2048  }
  0x29   : > { %694 = vsyncadd (%p782_p6), %s165_s4, 4294965248  ;;  %v835_v0 = vld [vmem:[%s168_s6 + $0x40] sm:$0xff]  ;;  %v837_v1 = vld [vmem:[%s168_s6 + $0x48] sm:$0xff]  ;;  %v254_v31 = vlaneseq  ;;  %vm259_vm0 = vcmask 130112   ;;  %vm263_vm1 = vcmask 195712   ;;  %vm267_vm2 = vcmask 261312  }
  0x2a   : > { %v839_v2 = vld [vmem:[%s168_s6] sm:$0xff]  ;;  %v222_v3 = vadd.f32 %v837_v1, %v835_v0  ;;  %v843_v4 = vld [vmem:[%s168_s6 + $0x8] sm:$0xff]  ;;  %v853_v9 = vld [vmem:[%s168_s6 + $0x50] sm:$0xff]  ;;  %vm276_vm3 = vcmask 1041409   ;;  %vm278_vm4 = vcmask 261120   ;;  %vm307_vm5 = vcmask 1041408  }
  0x2b   : > { %v845_v5 = vld [vmem:[%s168_s6 + $0x20] sm:$0xff]  ;;  %v847_v6 = vld [vmem:[%s168_s6 + $0x28] sm:$0xff]  ;;  %v210_v7 = vadd.f32 %v843_v4, %v839_v2  ;;  %v855_v10 = vld [vmem:[%s168_s6 + $0x58] sm:$0xff]  ;;  %v255_v32 = vand.u32 127, %v254_v31  ;;  %vm303_vm6 = vcmask 15360   ;;  %s902_s22 = scalar_lea.vmem [#allocation5], %s538_s30 }
  0x2c   : > { %v216_v8 = vadd.f32 %v847_v6, %v845_v5  ;;  %223 = vadd.xlane.f32.xlu1 %v222_v3  ;;  %v857_v11 = vld [vmem:[%s168_s6 + $0x10] sm:$0xff]  ;;  %v859_v12 = vld [vmem:[%s168_s6 + $0x18] sm:$0xff]  ;;  %v861_v13 = vld [vmem:[%s168_s6 + $0x60] sm:$0xff]  ;;  %v225_v15 = vadd.f32 %v855_v10, %v853_v9  ;;  %s553_s27 = sshll.u32 %s760_s16, 7  ;;  %s454_s4 = sshll.u32 %s902_s22, 4  ;;  %s455_s4 = int_to_ptr.vmem [resolvable:$true] %s454_s4 }
  0x2d   : > { %211 = vadd.xlane.f32.xlu0 %v210_v7  ;;  %v863_v14 = vld [vmem:[%s168_s6 + $0x68] sm:$0xff]  ;;  %v213_v16 = vadd.f32 %v859_v12, %v857_v11  ;;  %v871_v18 = vld [vmem:[%s168_s6 + $0x70] sm:$0xff]  ;;  %v873_v19 = vld [vmem:[%s168_s6 + $0x78] sm:$0xff]  ;;  %v257_v34 = vadd.s32 4294967288, %v255_v32  ;;  %v261_v43 = vadd.s32 4294967280, %v255_v32  ;;  %v265_v47 = vadd.s32 4294967272, %v255_v32  ;;  %s453_s30 = scalar_lea.hbm %s971_s3, %s553_s27 }
  0x2e   : > { %217 = vadd.xlane.f32.xlu2 %v216_v8  ;;  %v228_v17 = vadd.f32 %v863_v14, %v861_v13  ;;  %v875_v20 = vld [vmem:[%s168_s6 + $0x30] sm:$0xff]  ;;  %v877_v21 = vld [vmem:[%s168_s6 + $0x38] sm:$0xff]  ;;  %v231_v22 = vadd.f32 %v873_v19, %v871_v18  ;;  %v243_v26 = vld [vmem:[%s969_s1 + $0x8] sm:$0xff]  ;;  %s456_s6 = sshll.u32 %s453_s30, 4  ;;  %s441_s16 = scalar_lea.sflag [#allocation4], %s825_s29  ;;  %s457_s6 = int_to_ptr.hbm [resolvable:$true] %s456_s6 }
  0x2f   : > { %v219_v23 = vadd.f32 %v877_v21, %v875_v20  ;;  %v245_v24 = vld [vmem:[%s969_s1 + $0x18] sm:$0xff]  ;;  %v244_v25 = vld [vmem:[%s969_s1 + $0x10] sm:$0xff]  ;;  %v242_v27 = vld [vmem:[%s969_s1] sm:$0xff]  ;;  %s661_s23 = sshra.s32 %s457_s6, 4  ;;  %s667_s9 = scalar_lea.hbm %s971_s3, 256  ;;  %s662_s23 = int_to_ptr.hbm [resolvable:$true] %s661_s23 }
  0x30   : > { %293 = vmatpush.msra.mxu0 %v245_v24  ;;  %v302_v3 = vld [vmem:[%s970_s2] sm:$0x3]  ;;  %s663_s5 = scalar_lea.hbm %s662_s23, 128  ;;  %p668_p0 = scmp.lt.s32.totalorder %s662_s23, %s971_s3 }
  0x31   : > { %541 = vmatpush.msk.msra.mxu1 %vm307_vm5, %v302_v3  ;;  %p664_p6 = scmp.ne.s32.totalorder %s662_s23, %s663_s5  ;;  %p669_p1 = scmp.lt.s32.totalorder %s667_s9, %s663_s5 }
  0x32   : > { %294 = vmatpush.msra.mxu0 %v244_v25 }
  0x33   : > { %p665_p9 = pnand %p664_p6, %p789_p11  ;;  %p670_p3 = por %p669_p1, %p668_p0 }
  0x34   : > { %226 = vadd.xlane.f32.xlu1 %v225_v15  ;;  %295 = vmatpush.msra.mxu0 %v243_v26  ;;  %v352_v15 = vshrl.u32 %v254_v31, 7 }
  0x35   : > { %214 = vadd.xlane.f32.xlu0 %v213_v16  ;;  %p666_p13 = pneg %p665_p9 }
  0x36   : > { %229 = vadd.xlane.f32.xlu2 %v228_v17  ;;  %296 = vmatpush.msra.mxu0 %v242_v27  ;;  %v365_v16 = vadd.s32 16, %v352_v15  ;;  %v359_v17 = vadd.s32 8, %v352_v15 }
  0x37   : > { %604 = vset.pattern.permute.xlu2 %v352_v15  ;;  %p671_p4 = pnand %p670_p3, %p666_p13 }
  0x38   : > { %606 = vset.pattern.permute.xlu1 %v365_v16  ;;  %605 = vset.pattern.permute.xlu0 %v359_v17 }
  0x3c   : > { %232 = vadd.xlane.f32.xlu1 %v231_v22 }
  0x3d   : > { %220 = vadd.xlane.f32.xlu0 %v219_v23 }
  0x9f   : > { %v224_v28 = vpop.xlane.xlu1 %223 }
  0xa0   : > { %v212_v29 = vpop.xlane.xlu0 %211  ;;  %v238_v39 = vmul.f32 0.00390625, %v224_v28 }
  0xa1   : > { %v218_v30 = vpop.xlane.xlu2 %217  ;;  %v234_v40 = vmul.f32 0.00390625, %v212_v29 }
  0xa2   : > { %v269_v45 = vperm.slane %v238_v39, %v255_v32  ;;  %v236_v46 = vmul.f32 0.00390625, %v218_v30 }
  0xa3   : > { %v256_v48 = vperm.slane %v234_v40, %v255_v32 }
  0xa4   : > { %v262_v56 = vperm.slane %v236_v46, %v261_v43 }
  0xa7   : > { %v227_v33 = vpop.xlane.xlu1 %226 }
  0xa8   : > { %v239_v35 = vmul.f32 0.00390625, %v227_v33  ;;  %v215_v36 = vpop.xlane.xlu0 %214 }
  0xa9   : > { %v230_v37 = vpop.xlane.xlu2 %229  ;;  %v235_v38 = vmul.f32 0.00390625, %v215_v36 }
  0xaa   : > { %v240_v41 = vmul.f32 0.00390625, %v230_v37  ;;  %v270_v42 = vperm.slane %v239_v35, %v257_v34  ;;  %v371_v37 = vadd.s32 24, %v352_v15 }
  0xab   : > { %v258_v44 = vperm.slane %v235_v38, %v257_v34 }
  0xac   : > { %v272_v49 = vperm.slane %v240_v41, %v261_v43  ;;  %v271_v51 = vsel %vm259_vm0, %v270_v42, %v269_v45 }
  0xad   : > { %v260_v54 = vsel %vm259_vm0, %v258_v44, %v256_v48 }
  0xae   : > { %v273_v59 = vsel %vm263_vm1, %v272_v49, %v271_v51  ;;  %v264_v60 = vsel %vm263_vm1, %v262_v56, %v260_v54 }
  0xaf   : > { %v233_v50 = vpop.xlane.xlu1 %232 }
  0xb0   : > { %v241_v52 = vmul.f32 0.00390625, %v233_v50  ;;  %v221_v53 = vpop.xlane.xlu0 %220 }
  0xb1   : > { %v237_v55 = vmul.f32 0.00390625, %v221_v53 }
  0xb2   : > { %v274_v57 = vperm.slane %v241_v52, %v265_v47 }
  0xb3   : > { %v266_v58 = vperm.slane %v237_v55, %v265_v47 }
  0xb4   : > { %v275_v61 = vsel %vm267_vm2, %v274_v57, %v273_v59 }
  0xb5   : > { %v268_v62 = vsel %vm267_vm2, %v266_v58, %v264_v60 }
  0xb6   : > { %v277_v63 = vsel %vm276_vm3, %v275_v61, %v268_v62 }
  0xb7   : > { %540 = vmatmul.msk.f32.vlgmr.msra.gmra.mxu0 %vm278_vm4, %v277_v63 }
 0x134   : > { %v298_v7 = vpop.f32.mrf.mxu0 }
 0x135   : > { %v301_v8 = vmax.f32 %v298_v7, 0.0 }
 0x137   : > { %542 = vmatmul.msk.f32.vlgmr.msra.gmra.mxu1 %vm303_vm6, %v301_v8 }
 0x1b4   : > { %v328_v22 = vpop.f32.mrf.mxu1 }
 0x1b5   : > { %v543_v23 = vmul.f32 -1.442695, %v328_v22 }
 0x1b7   : > { %613 = vpow2.f32 %v543_v23 }
 0x1bd   : > { %v614_v24 = vpop.eup %613 }
 0x1be   : > { %v334_v25 = vadd.f32 1.0, %v614_v24 }
 0x1c0   : > { %615 = vrcp.f32 %v334_v25  ;;  %v346_v29 = vand.u32 2147483648, %v334_v25  ;;  %v344_v32 = vand.u32 2147483647, %v334_v25  ;;  %vm340_vm8 = vweird.f32 %v334_v25 }
 0x1c2   : > { %v347_v31 = vor.u32 1.1754944e-38, %v346_v29  ;;  %vm345_vm10 = vcmp.eq.f32.partialorder %v344_v32, 8.507059e+37 }
 0x1c6   : > { %v616_v26 = vpop.eup %615 }
 0x1c7   : > { %v336_v27 = vmul.f32 %v616_v26, %v334_v25  ;;  %vm341_vm7 = vweird.f32 %v616_v26 }
 0x1c8   : > { %vm342_vm9 = vmor %vm340_vm8, %vm341_vm7 }
 0x1c9   : > { %v337_v28 = vsub.f32 1.0, %v336_v27 }
 0x1cb   : > { %v338_v30 = vmul.f32 %v616_v26, %v337_v28 }
 0x1cd   : > { %v339_v33 = vadd.f32 %v616_v26, %v338_v30 }
 0x1cf   : > { %v343_v34 = vsel %vm342_vm9, %v616_v26, %v339_v33 }
 0x1d0   : > { %v348_v35 = vsel %vm345_vm10, %v347_v31, %v343_v34 }
 0x1d1   : > { %v350_v36 = vperm.slane %v348_v35, 0  ;;  %v375_v38 = vperm.slane %v348_v35, 1 }
 0x1d3   : > { %367 = vperm.xlu1 %606, %v350_v36   ;;  %361 = vperm.xlu0 %605, %v350_v36  }
 0x1d4   : > { %355 = vperm.xlu2 %604, %v350_v36  }
 0x1db   : > { %609 = vset.pattern.permute.xlu1 %v359_v17  ;;  %612 = vset.pattern.permute.xlu0 %v371_v37 }
 0x1dc   : > { %607 = vset.pattern.permute.xlu2 %v371_v37 }
 0x1e3   : > { %386 = vperm.xlu1 %609, %v375_v38  }
 0x1e4   : > { %373 = vperm.xlu2 %607, %v350_v36  }
 0x1eb   : > { %611 = vset.pattern.permute.xlu1 %v371_v37 }
 0x1ec   : > { %608 = vset.pattern.permute.xlu2 %v352_v15 }
 0x1f3   : > { %398 = vperm.xlu1 %611, %v375_v38  }
 0x1f4   : > { %380 = vperm.xlu2 %608, %v375_v38  }
 0x1fc   : > { %610 = vset.pattern.permute.xlu2 %v365_v16 }
 0x204   : > { %392 = vperm.xlu2 %610, %v375_v38  }
 0x22e   : > { %v356_v39 = vpop.permute.xlu2 %355 }
 0x22f   : > { %v400_v40 = vadd.f32 1.0, %v356_v39 }
 0x231   : > { %v408_v41 = vmul.f32 %v400_v40, %v839_v2  ;;  %v409_v42 = vmul.f32 %v400_v40, %v843_v4 }
 0x233   : > { %424 = vst [vmem:[%s902_s22] sm:$0xff] %v408_v41 }
 0x234   : > { %425 = vst [vmem:[%s902_s22 + $0x8] sm:$0xff] %v409_v42 }
 0x23e   : > { %v374_v43 = vpop.permute.xlu2 %373 }
 0x23f   : > { %v403_v44 = vadd.f32 1.0, %v374_v43 }
 0x241   : > { %v414_v45 = vmul.f32 %v403_v44, %v875_v20  ;;  %v415_v2 = vmul.f32 %v403_v44, %v877_v21 }
 0x243   : > { %430 = vst [vmem:[%s902_s22 + $0x30] sm:$0xff] %v414_v45 }
 0x244   : > { %431 = vst [vmem:[%s902_s22 + $0x38] sm:$0xff] %v415_v2 }
 0x245   : > { %v368_v4 = vpop.permute.xlu1 %367  ;;  %v362_v46 = vpop.permute.xlu0 %361 }
 0x246   : > { %v402_v47 = vadd.f32 1.0, %v368_v4  ;;  %v401_v48 = vadd.f32 1.0, %v362_v46 }
 0x248   : > { %v412_v49 = vmul.f32 %v402_v47, %v845_v5  ;;  %v413_v50 = vmul.f32 %v402_v47, %v847_v6  ;;  %v410_v51 = vmul.f32 %v401_v48, %v857_v11  ;;  %v411_v52 = vmul.f32 %v401_v48, %v859_v12 }
 0x24a   : > { %428 = vst [vmem:[%s902_s22 + $0x20] sm:$0xff] %v412_v49 }
 0x24b   : > { %429 = vst [vmem:[%s902_s22 + $0x28] sm:$0xff] %v413_v50 }
 0x24c   : > { %426 = vst [vmem:[%s902_s22 + $0x10] sm:$0xff] %v410_v51 }
 0x24d   : > { %427 = vst [vmem:[%s902_s22 + $0x18] sm:$0xff] %v411_v52 }
 0x24e   : > { %v381_v20 = vpop.permute.xlu2 %380 }
 0x24f   : > { %v404_v21 = vadd.f32 1.0, %v381_v20 }
 0x251   : > { %v416_v53 = vmul.f32 %v404_v21, %v835_v0  ;;  %v417_v5 = vmul.f32 %v404_v21, %v837_v1 }
 0x253   : > { %432 = vst [vmem:[%s902_s22 + $0x40] sm:$0xff] %v416_v53 }
 0x254   : > { %433 = vst [vmem:[%s902_s22 + $0x48] sm:$0xff] %v417_v5 }
 0x255   : > { %v387_v6 = vpop.permute.xlu1 %386 }
 0x256   : > { %v405_v11 = vadd.f32 1.0, %v387_v6 }
 0x258   : > { %v418_v12 = vmul.f32 %v405_v11, %v853_v9  ;;  %v419_v54 = vmul.f32 %v405_v11, %v855_v10 }
 0x25a   : > { %434 = vst [vmem:[%s902_s22 + $0x50] sm:$0xff] %v418_v12 }
 0x25b   : > { %435 = vst [vmem:[%s902_s22 + $0x58] sm:$0xff] %v419_v54 }
 0x25e   : > { %v393_v55 = vpop.permute.xlu2 %392 }
 0x25f   : > { %v406_v56 = vadd.f32 1.0, %v393_v55 }
 0x261   : > { %v420_v0 = vmul.f32 %v406_v56, %v861_v13  ;;  %v421_v1 = vmul.f32 %v406_v56, %v863_v14 }
 0x263   : > { %436 = vst [vmem:[%s902_s22 + $0x60] sm:$0xff] %v420_v0 }
 0x264   : > { %437 = vst [vmem:[%s902_s22 + $0x68] sm:$0xff] %v421_v1 }
 0x265   : > { %v399_v9 = vpop.permute.xlu1 %398 }
 0x266   : > { %v407_v10 = vadd.f32 1.0, %v399_v9 }
 0x268   : > { %v422_v57 = vmul.f32 %v407_v10, %v871_v18  ;;  %v423_v58 = vmul.f32 %v407_v10, %v873_v19 }
 0x26a   : > { %438 = vst [vmem:[%s902_s22 + $0x70] sm:$0xff] %v422_v57 }
 0x26b   : > { %439 = vst [vmem:[%s902_s22 + $0x78] sm:$0xff] %v423_v58 }
 0x26c   : > { %674 = shalt.err (!%p671_p4)
}
 0x26d   : > { %s717_s29 = smov 256   ;;  %s718_s17 = smov 16  }
 0x26e   : > { %556 = dma.vmem_to_hbm [thread:$0]  (%p789_p11), %s455_s4, 2048, %s457_s6, %s441_s16, %s717_s29, %s717_s29, %s718_s17  }
 0x26f PF: > { %s471_s19 = sand.u32 1, %s701_s12   ;;  %p977_p7 = scmp.ge.s32.totalorder %s713_s15, 2 }
 0x270   : > { %s472_s20 = scalar_lea.sflag [#allocation4], %s471_s19 }
 0x271   : > { %p563_p5 = pnand %p977_p7, %p793_p12 }
 0x273   : > { %p564_p8 = pneg %p563_p5 }
 0x275   : > { %696 = dma.done.wait (%p564_p8), %s472_s20, 2048  }
 0x276   : > { %698 = vsyncadd (%p564_p8), %s472_s20, 4294965248  ;;  %p16_p10 = scmp.ge.s32.totalorder %s764_s18, 4   ;;  %s978_s12 = smov %s705_s13 }
 0x277   : > { %s979_s13 = smov %s709_s14  ;;  %s980_s14 = smov %s776_s21 }
 0x278   : > { %s981_s15 = smov %s764_s18  ;;  %18 = sbr.rel (!%p16_p10) target bundleno = 5 (0x5), region = 77 }
 0x27d   :  { %478 = vsyncpa [#allocation3], 1 }
 0x27e   :  { %480 = vsyncpa [#allocation3 + $0x1], 1 }
 0x27f   :  { %481 = vsyncpa [#allocation4], 1 }
 0x280   :  { %483 = vsyncpa [#allocation4 + $0x1], 1 }

</bundles_post_ra>
